<compile_context>
chip_gen: v5e
topology: v5e:2x2
jax: 0.10.0
libtpu: 0.0.40
codegen_flags: <defaults>
</compile_context>

<pallas_src>
import functools

import jax
import jax.numpy as jnp
from jax import lax
from jax.experimental import pallas as pl
from jax.experimental.pallas import tpu as pltpu

ALPHA = 0.3
BETA = 0.7
EPSILON = 1e-6


def _tversky_kernel(logits_ref, tgt_ref, tp_out, sp_out, ct_out,
                    tp_s, sp_s, ct_s, *,
                    num_valid, tile, tiles_per_split, needs_mask):
    s = pl.program_id(1)                  # spatial split (parallel)
    h = pl.program_id(2)                  # tile within split (reduction)

    # --- per-(batch, split) accumulator init --------------------------------
    @pl.when(h == 0)
    def _():
        tp_s[...] = jnp.zeros_like(tp_s)
        sp_s[...] = jnp.zeros_like(sp_s)
        ct_s[...] = jnp.zeros_like(ct_s)

    # --- hot path: channel softmax + fused one-hot select -------------------
    x = logits_ref[0].astype(jnp.float32)          # (C, TILE), upcast in-kernel
    t = tgt_ref[0].astype(jnp.int32)               # (1, TILE)

    m = jnp.max(x, axis=0, keepdims=True)          # (1, TILE)
    e = jnp.exp(x - m)                             # (C, TILE)  (EUP)
    # Exact reciprocal (approx=True would risk the 1e-5 tolerance).
    p = e * pl.reciprocal(jnp.sum(e, axis=0, keepdims=True), approx=False)

    classes = lax.broadcasted_iota(jnp.int32, x.shape, 0)      # (C, TILE)
    hit = classes == t                                          # (C, TILE) bool

    if needs_mask:
        # Edge blocks (and dead blocks from the split) carry undefined data;
        # use where-selects (NOT multiplies) so NaN/Inf cannot leak in.
        lane = lax.broadcasted_iota(jnp.int32, (1, x.shape[1]), 1)
        offset = (s * tiles_per_split + h) * tile
        valid = (lane + offset) < num_valid                      # (1, TILE)
        hit = jnp.logical_and(hit, valid)
        p = jnp.where(valid, p, 0.0)

    # Only tp, sum(p) and one-hot counts are needed (softmax sums to 1):
    #   fp_c = sum_p_c - tp_c ; fn_c = count_c - tp_c
    tp_s[...] += jnp.sum(jnp.where(hit, p, 0.0), axis=1, keepdims=True)   # (C,1)
    sp_s[...] += jnp.sum(p, axis=1, keepdims=True)
    ct_s[...] += jnp.sum(jnp.where(hit, 1.0, 0.0), axis=1, keepdims=True)

    # --- finalize: emit raw per-class partial sums for this (batch, split) ---
    @pl.when(h == pl.num_programs(2) - 1)
    def _():
        tp_out[...] = tp_s[...][None, None]        # (1, 1, C, 1)
        sp_out[...] = sp_s[...][None, None]
        ct_out[...] = ct_s[...][None, None]


def tversky_loss(logits, targets, *, alpha=ALPHA, beta=BETA, epsilon=EPSILON,
                 weight=None, max_tile_lanes=None):
    """logits: (N, C, H, W) float; targets: (N, H, W) int in [0, C)."""
    N, C, H, W = logits.shape
    HW = H * W
    logits_itemsize = logits.dtype.itemsize

    # Targets: accept int8/uint8/int32 natively (cast per-tile in the kernel)
    # to avoid an extra HBM pass and to cut target traffic for small C.
    if targets.dtype in (jnp.int8, jnp.uint8, jnp.int32):
        targets_r = targets.reshape(N, 1, HW)
    else:
        targets_r = targets.reshape(N, 1, HW).astype(jnp.int32)
    tgt_itemsize = targets_r.dtype.itemsize

    # --- generation-aware VMEM budget ---------------------------------------
    try:
        phys_vmem = int(pltpu.get_tpu_info().vmem_capacity_bytes)
    except Exception:  # be robust if the query is unavailable
        phys_vmem = 64 * 1024 * 1024
    if phys_vmem >= 128 * 1024 * 1024:          # v5e / v6e
        vmem_limit = 64 * 1024 * 1024
    else:                                       # v7x (64 MiB physical)
        vmem_limit = min(48 * 1024 * 1024, phys_vmem * 3 // 4)

    # --- tile selection: multiple of 128, VMEM-budget driven -----------------
    # Resident bytes per spatial lane: double-buffered inputs + ~6 live (C,T)
    # f32 temporaries in the hot path (x, e, p, iota, selects).
    bytes_per_lane = 2 * (C * logits_itemsize + tgt_itemsize) + 6 * C * 4
    budget = max(vmem_limit - 4 * 1024 * 1024, 2 * 1024 * 1024)
    tile_cap = max(128, (budget // bytes_per_lane) // 128 * 128)
    # Keep the logits block itself <= ~8 MiB (review's target band).
    lane_cap = max(128, ((8 * 1024 * 1024) // max(C * logits_itemsize, 1)) // 128 * 128)
    tile_cap = min(tile_cap, lane_cap)
    if max_tile_lanes is not None:              # test/tuning knob
        tile_cap = max(128, (min(tile_cap, max_tile_lanes) // 128) * 128)
    hw_pad = pl.cdiv(HW, 128) * 128
    tile = int(min(tile_cap, hw_pad))
    n_tiles = int(pl.cdiv(HW, tile))

    # --- spatial split for v7x megacore coverage (harmless on 1-TC chips) ----
    n_splits = 2 if n_tiles >= 2 else 1
    tps = int(pl.cdiv(n_tiles, n_splits))
    has_dead = (n_splits * tps) != n_tiles           # fully-OOB grid points exist
    needs_mask = (n_splits * tps * tile) != HW       # any padded/dead lanes

    if has_dead:
        def spatial_block(si, hi):
            # Clamp dead blocks onto the last real tile (their data is fully
            # masked in-kernel via the lane/offset check).
            return jnp.minimum(si * tps + hi, n_tiles - 1)
    else:
        def spatial_block(si, hi):
            return si * tps + hi

    kernel = functools.partial(
        _tversky_kernel,
        num_valid=HW, tile=tile, tiles_per_split=tps, needs_mask=needs_mask,
    )

    part_shape = jax.ShapeDtypeStruct((N, n_splits, C, 1), jnp.float32)

    tp_p, sp_p, ct_p = pl.pallas_call(
        kernel,
        out_shape=(part_shape, part_shape, part_shape),
        grid_spec=pltpu.PrefetchScalarGridSpec(
            num_scalar_prefetch=0,
            grid=(N, n_splits, tps),
            in_specs=[
                pl.BlockSpec((1, C, tile), lambda n, s, h: (n, 0, spatial_block(s, h))),
                pl.BlockSpec((1, 1, tile), lambda n, s, h: (n, 0, spatial_block(s, h))),
            ],
            out_specs=(
                pl.BlockSpec((1, 1, C, 1), lambda n, s, h: (n, s, 0, 0)),
                pl.BlockSpec((1, 1, C, 1), lambda n, s, h: (n, s, 0, 0)),
                pl.BlockSpec((1, 1, C, 1), lambda n, s, h: (n, s, 0, 0)),
            ),
            scratch_shapes=[
                pltpu.VMEM((C, 1), jnp.float32),   # per-class true positives
                pltpu.VMEM((C, 1), jnp.float32),   # per-class sum of softmax probs
                pltpu.VMEM((C, 1), jnp.float32),   # per-class one-hot counts
            ],
        ),
        compiler_params=pltpu.CompilerParams(
            # batch and split axes independent -> megacore-shardable on v7x
            dimension_semantics=("parallel", "parallel", "arbitrary"),
            vmem_limit_bytes=int(vmem_limit),
        ),
    )(logits.reshape(N, C, HW), targets_r)

    # --- tiny wrapper-side combine (non-linear score after summing splits) ---
    tp = jnp.sum(tp_p[..., 0], axis=1)               # (N, C)
    sp = jnp.sum(sp_p[..., 0], axis=1)
    ct = jnp.sum(ct_p[..., 0], axis=1)
    fp = sp - tp
    fn = ct - tp
    if weight is not None:
        w = jnp.asarray(weight, jnp.float32)
        tp = w * tp
        fp = w * fp
        fn = w * fn
    scores = (tp + epsilon) / (tp + alpha * fp + beta * fn + epsilon)
    return 1.0 - jnp.mean(scores)


def _tversky_loss_ref(logits, targets, alpha=ALPHA, beta=BETA, epsilon=EPSILON,
                      weight=None):
    """Pure-JAX reference mirroring the PyTorch module."""
    num_classes = logits.shape[1]
    onehot = jax.nn.one_hot(targets, num_classes, dtype=jnp.float32)   # (N,H,W,C)
    onehot = jnp.transpose(onehot, (0, 3, 1, 2))                       # (N,C,H,W)
    probs = jax.nn.softmax(logits.astype(jnp.float32), axis=1)
    tp = jnp.sum(probs * onehot, axis=(2, 3))
    fn = jnp.sum(onehot * (1.0 - probs), axis=(2, 3))
    fp = jnp.sum((1.0 - onehot) * probs, axis=(2, 3))
    if weight is not None:
        w = jnp.asarray(weight, jnp.float32)
        tp = w * tp
        fn = w * fn
        fp = w * fp
    scores = (tp + epsilon) / (tp + alpha * fp + beta * fn + epsilon)
    return 1.0 - jnp.mean(scores)


if __name__ == "__main__":
    key = jax.random.PRNGKey(0)
    keys = jax.random.split(key, 8)

    # 1) Aligned spatial size (HW % 128 == 0), single tile, no masking.
    N, C, H, W = 2, 4, 16, 16
    logits = jax.random.normal(keys[0], (N, C, H, W), dtype=jnp.float32)
    targets = jax.random.randint(keys[1], (N, H, W), 0, C, dtype=jnp.int32)
    loss = jax.block_until_ready(tversky_loss(logits, targets))
    ref = jax.block_until_ready(_tversky_loss_ref(logits, targets))
    assert jnp.allclose(loss, ref, atol=1e-5, rtol=1e-5), (loss, ref)

    # 2) Unaligned spatial size: edge block padded by Pallas, where-masked
    #    in-kernel (no wrapper-side jnp.pad HBM pass).
    H2, W2 = 10, 10
    logits2 = jax.random.normal(keys[2], (N, C, H2, W2), dtype=jnp.float32)
    targets2 = jax.random.randint(keys[3], (N, H2, W2), 0, C, dtype=jnp.int32)
    loss2 = jax.block_until_ready(tversky_loss(logits2, targets2))
    ref2 = jax.block_until_ready(_tversky_loss_ref(logits2, targets2))
    assert jnp.allclose(loss2, ref2, atol=1e-5, rtol=1e-5), (loss2, ref2)

    # 3) Multi-tile reduction + spatial core-split + dead-block clamp + tail
    #    mask (HW=576, tile forced to 128 -> 5 tiles -> 2 splits x 3 tiles).
    H3, W3 = 24, 24
    logits3 = jax.random.normal(keys[4], (N, C, H3, W3), dtype=jnp.float32)
    targets3 = jax.random.randint(keys[5], (N, H3, W3), 0, C, dtype=jnp.int32)
    loss3 = jax.block_until_ready(tversky_loss(logits3, targets3, max_tile_lanes=128))
    ref3 = jax.block_until_ready(_tversky_loss_ref(logits3, targets3))
    assert jnp.allclose(loss3, ref3, atol=1e-5, rtol=1e-5), (loss3, ref3)

    # 4) bf16 logits (upcast in-kernel), uint8 targets (cast in-kernel),
    #    per-class weight, N=1.
    N4, C4, H4, W4 = 1, 6, 16, 16
    logits4 = jax.random.normal(keys[6], (N4, C4, H4, W4), dtype=jnp.bfloat16)
    targets4 = jax.random.randint(keys[7], (N4, H4, W4), 0, C4,
                                  dtype=jnp.int32).astype(jnp.uint8)
    w4 = jnp.array([1.0, 0.5, 2.0, 1.5, 0.25, 1.0], dtype=jnp.float32)
    loss4 = jax.block_until_ready(tversky_loss(logits4, targets4, weight=w4))
    ref4 = jax.block_until_ready(_tversky_loss_ref(logits4, targets4, weight=w4))
    assert jnp.allclose(loss4, ref4, atol=1e-5, rtol=1e-5), (loss4, ref4)

    print("KERNEL_OK")
</pallas_src>

<mosaic_0001>
module attributes {stable_mosaic.version = 11 : i64} {
  func.func @_tversky_kernel(%arg0: i32, %arg1: i32, %arg2: i32, %arg3: memref<1x4x256xf32, #tpu.memory_space<vmem>>, %arg4: memref<1x1x256xi32, #tpu.memory_space<vmem>>, %arg5: memref<1x1x4x1xf32, #tpu.memory_space<vmem>>, %arg6: memref<1x1x4x1xf32, #tpu.memory_space<vmem>>, %arg7: memref<1x1x4x1xf32, #tpu.memory_space<vmem>>, %arg8: memref<4x1xf32, #tpu.memory_space<vmem>>, %arg9: memref<4x1xf32, #tpu.memory_space<vmem>>, %arg10: memref<4x1xf32, #tpu.memory_space<vmem>>) attributes {dimension_semantics = [#tpu.dimension_semantics<parallel>, #tpu.dimension_semantics<parallel>, #tpu.dimension_semantics<arbitrary>], iteration_bounds = array<i64: 2, 1, 1>, scalar_prefetch = 0 : i64, scratch_operands = 3 : i64, tpu.core_type = #tpu.core_type<tc>, window_params = [{transform_indices = @transform_0, window_bounds = array<i64: 1, 4, 256>}, {transform_indices = @transform_1, window_bounds = array<i64: 1, 1, 256>}, {transform_indices = @transform_2, window_bounds = array<i64: 1, 1, 4, 1>}, {transform_indices = @transform_3, window_bounds = array<i64: 1, 1, 4, 1>}, {transform_indices = @transform_4, window_bounds = array<i64: 1, 1, 4, 1>}]} {
    %c0_i32 = arith.constant 0 : i32
    %0 = arith.cmpi eq, %arg2, %c0_i32 : i32
    %1 = arith.extui %0 : i1 to i32
    %c0_i32_0 = arith.constant 0 : i32
    %2 = arith.cmpi ne, %1, %c0_i32_0 : i32
    scf.if %2 {
      %cst_27 = arith.constant 0.000000e+00 : f32
      %43 = vector.broadcast %cst_27 : f32 to vector<4x1xf32>
      %c0_28 = arith.constant 0 : index
      %c0_29 = arith.constant 0 : index
      %44 = vector.load %arg8[%c0_28, %c0_29] : memref<4x1xf32, #tpu.memory_space<vmem>>, vector<4x1xf32>
      tpu.vector_store %arg8[%c0_28, %c0_29], %43 {strides = array<i32>} : memref<4x1xf32, #tpu.memory_space<vmem>>, vector<4x1xf32>,
      %cst_30 = arith.constant 0.000000e+00 : f32
      %45 = vector.broadcast %cst_30 : f32 to vector<4x1xf32>
      %c0_31 = arith.constant 0 : index
      %c0_32 = arith.constant 0 : index
      %46 = vector.load %arg9[%c0_31, %c0_32] : memref<4x1xf32, #tpu.memory_space<vmem>>, vector<4x1xf32>
      tpu.vector_store %arg9[%c0_31, %c0_32], %45 {strides = array<i32>} : memref<4x1xf32, #tpu.memory_space<vmem>>, vector<4x1xf32>,
      %cst_33 = arith.constant 0.000000e+00 : f32
      %47 = vector.broadcast %cst_33 : f32 to vector<4x1xf32>
      %c0_34 = arith.constant 0 : index
      %c0_35 = arith.constant 0 : index
      %48 = vector.load %arg10[%c0_34, %c0_35] : memref<4x1xf32, #tpu.memory_space<vmem>>, vector<4x1xf32>
      tpu.vector_store %arg10[%c0_34, %c0_35], %47 {strides = array<i32>} : memref<4x1xf32, #tpu.memory_space<vmem>>, vector<4x1xf32>,
    } else {
    }
    %c0 = arith.constant 0 : index
    %c0_1 = arith.constant 0 : index
    %c0_2 = arith.constant 0 : index
    %3 = vector.load %arg3[%c0, %c0_1, %c0_2] : memref<1x4x256xf32, #tpu.memory_space<vmem>>, vector<1x4x256xf32>
    %4 = vector.shape_cast %3 : vector<1x4x256xf32> to vector<4x256xf32>
    %c0_3 = arith.constant 0 : index
    %c0_4 = arith.constant 0 : index
    %c0_5 = arith.constant 0 : index
    %5 = vector.load %arg4[%c0_3, %c0_4, %c0_5] : memref<1x1x256xi32, #tpu.memory_space<vmem>>, vector<1x1x256xi32>
    %6 = vector.shape_cast %5 : vector<1x1x256xi32> to vector<1x256xi32>
    %cst = arith.constant dense<0xFF800000> : vector<256xf32>
    %7 = vector.multi_reduction <maximumf>, %4, %cst [0] : vector<4x256xf32> to vector<256xf32>
    %8 = vector.shape_cast %7 : vector<256xf32> to vector<1x256xf32>
    %9 = vector.broadcast %8 : vector<1x256xf32> to vector<4x256xf32>
    %10 = arith.subf %4, %9 : vector<4x256xf32>
    %11 = math.exp %10 : vector<4x256xf32>
    %cst_6 = arith.constant dense<0.000000e+00> : vector<256xf32>
    %12 = vector.multi_reduction <add>, %11, %cst_6 [0] : vector<4x256xf32> to vector<256xf32>
    %13 = vector.shape_cast %12 : vector<256xf32> to vector<1x256xf32>
    %14 = tpu.reciprocal %13 : vector<1x256xf32> -> vector<1x256xf32>
    %15 = vector.broadcast %14 : vector<1x256xf32> to vector<4x256xf32>
    %16 = arith.mulf %11, %15 : vector<4x256xf32>
    %17 = tpu.iota {dimensions = array<i32: 0>} : vector<4x256xi32>
    %18 = vector.broadcast %6 : vector<1x256xi32> to vector<4x256xi32>
    %19 = arith.cmpi eq, %17, %18 : vector<4x256xi32>
    %c0_7 = arith.constant 0 : index
    %c0_8 = arith.constant 0 : index
    %20 = vector.load %arg8[%c0_7, %c0_8] : memref<4x1xf32, #tpu.memory_space<vmem>>, vector<4x1xf32>
    %cst_9 = arith.constant 0.000000e+00 : f32
    %21 = vector.broadcast %cst_9 : f32 to vector<4x256xf32>
    %22 = arith.select %19, %16, %21 : vector<4x256xi1>, vector<4x256xf32>
    %cst_10 = arith.constant dense<0.000000e+00> : vector<4xf32>
    %23 = vector.multi_reduction <add>, %22, %cst_10 [1] : vector<4x256xf32> to vector<4xf32>
    %24 = vector.shape_cast %23 : vector<4xf32> to vector<4x1xf32>
    %25 = arith.addf %20, %24 : vector<4x1xf32>
    %c0_11 = arith.constant 0 : index
    %c0_12 = arith.constant 0 : index
    %26 = vector.load %arg8[%c0_11, %c0_12] : memref<4x1xf32, #tpu.memory_space<vmem>>, vector<4x1xf32>
    tpu.vector_store %arg8[%c0_11, %c0_12], %25 {strides = array<i32>} : memref<4x1xf32, #tpu.memory_space<vmem>>, vector<4x1xf32>,
    %c0_13 = arith.constant 0 : index
    %c0_14 = arith.constant 0 : index
    %27 = vector.load %arg9[%c0_13, %c0_14] : memref<4x1xf32, #tpu.memory_space<vmem>>, vector<4x1xf32>
    %cst_15 = arith.constant dense<0.000000e+00> : vector<4xf32>
    %28 = vector.multi_reduction <add>, %16, %cst_15 [1] : vector<4x256xf32> to vector<4xf32>
    %29 = vector.shape_cast %28 : vector<4xf32> to vector<4x1xf32>
    %30 = arith.addf %27, %29 : vector<4x1xf32>
    %c0_16 = arith.constant 0 : index
    %c0_17 = arith.constant 0 : index
    %31 = vector.load %arg9[%c0_16, %c0_17] : memref<4x1xf32, #tpu.memory_space<vmem>>, vector<4x1xf32>
    tpu.vector_store %arg9[%c0_16, %c0_17], %30 {strides = array<i32>} : memref<4x1xf32, #tpu.memory_space<vmem>>, vector<4x1xf32>,
    %c0_18 = arith.constant 0 : index
    %c0_19 = arith.constant 0 : index
    %32 = vector.load %arg10[%c0_18, %c0_19] : memref<4x1xf32, #tpu.memory_space<vmem>>, vector<4x1xf32>
    %cst_20 = arith.constant 1.000000e+00 : f32
    %cst_21 = arith.constant 0.000000e+00 : f32
    %33 = vector.broadcast %cst_20 : f32 to vector<4x256xf32>
    %34 = vector.broadcast %cst_21 : f32 to vector<4x256xf32>
    %35 = arith.select %19, %33, %34 : vector<4x256xi1>, vector<4x256xf32>
    %cst_22 = arith.constant dense<0.000000e+00> : vector<4xf32>
    %36 = vector.multi_reduction <add>, %35, %cst_22 [1] : vector<4x256xf32> to vector<4xf32>
    %37 = vector.shape_cast %36 : vector<4xf32> to vector<4x1xf32>
    %38 = arith.addf %32, %37 : vector<4x1xf32>
    %c0_23 = arith.constant 0 : index
    %c0_24 = arith.constant 0 : index
    %39 = vector.load %arg10[%c0_23, %c0_24] : memref<4x1xf32, #tpu.memory_space<vmem>>, vector<4x1xf32>
    tpu.vector_store %arg10[%c0_23, %c0_24], %38 {strides = array<i32>} : memref<4x1xf32, #tpu.memory_space<vmem>>, vector<4x1xf32>,
    %c0_i32_25 = arith.constant 0 : i32
    %40 = arith.cmpi eq, %arg2, %c0_i32_25 : i32
    %41 = arith.extui %40 : i1 to i32
    %c0_i32_26 = arith.constant 0 : i32
    %42 = arith.cmpi ne, %41, %c0_i32_26 : i32
    scf.if %42 {
      %c0_27 = arith.constant 0 : index
      %c0_28 = arith.constant 0 : index
      %43 = vector.load %arg8[%c0_27, %c0_28] : memref<4x1xf32, #tpu.memory_space<vmem>>, vector<4x1xf32>
      %44 = vector.shape_cast %43 : vector<4x1xf32> to vector<1x1x4x1xf32>
      %c0_29 = arith.constant 0 : index
      %c0_30 = arith.constant 0 : index
      %c0_31 = arith.constant 0 : index
      %c0_32 = arith.constant 0 : index
      %45 = vector.load %arg5[%c0_29, %c0_30, %c0_31, %c0_32] : memref<1x1x4x1xf32, #tpu.memory_space<vmem>>, vector<1x1x4x1xf32>
      tpu.vector_store %arg5[%c0_29, %c0_30, %c0_31, %c0_32], %44 {strides = array<i32>} : memref<1x1x4x1xf32, #tpu.memory_space<vmem>>, vector<1x1x4x1xf32>,
      %c0_33 = arith.constant 0 : index
      %c0_34 = arith.constant 0 : index
      %46 = vector.load %arg9[%c0_33, %c0_34] : memref<4x1xf32, #tpu.memory_space<vmem>>, vector<4x1xf32>
      %47 = vector.shape_cast %46 : vector<4x1xf32> to vector<1x1x4x1xf32>
      %c0_35 = arith.constant 0 : index
      %c0_36 = arith.constant 0 : index
      %c0_37 = arith.constant 0 : index
      %c0_38 = arith.constant 0 : index
      %48 = vector.load %arg6[%c0_35, %c0_36, %c0_37, %c0_38] : memref<1x1x4x1xf32, #tpu.memory_space<vmem>>, vector<1x1x4x1xf32>
      tpu.vector_store %arg6[%c0_35, %c0_36, %c0_37, %c0_38], %47 {strides = array<i32>} : memref<1x1x4x1xf32, #tpu.memory_space<vmem>>, vector<1x1x4x1xf32>,
      %c0_39 = arith.constant 0 : index
      %c0_40 = arith.constant 0 : index
      %49 = vector.load %arg10[%c0_39, %c0_40] : memref<4x1xf32, #tpu.memory_space<vmem>>, vector<4x1xf32>
      %50 = vector.shape_cast %49 : vector<4x1xf32> to vector<1x1x4x1xf32>
      %c0_41 = arith.constant 0 : index
      %c0_42 = arith.constant 0 : index
      %c0_43 = arith.constant 0 : index
      %c0_44 = arith.constant 0 : index
      %51 = vector.load %arg7[%c0_41, %c0_42, %c0_43, %c0_44] : memref<1x1x4x1xf32, #tpu.memory_space<vmem>>, vector<1x1x4x1xf32>
      tpu.vector_store %arg7[%c0_41, %c0_42, %c0_43, %c0_44], %50 {strides = array<i32>} : memref<1x1x4x1xf32, #tpu.memory_space<vmem>>, vector<1x1x4x1xf32>,
    } else {
    }
    return
  }
  func.func @transform_0(%arg0: i32, %arg1: i32, %arg2: i32) -> (i32, i32, i32) {
    %c1_i32 = arith.constant 1 : i32
    %0 = arith.muli %arg1, %c1_i32 : i32
    %1 = arith.addi %0, %arg2 : i32
    %c0_i32 = arith.constant 0 : i32
    %c0_i32_0 = arith.constant 0 : i32
    return %arg0, %c0_i32, %1 : i32, i32, i32
  }
  func.func @transform_1(%arg0: i32, %arg1: i32, %arg2: i32) -> (i32, i32, i32) {
    %c1_i32 = arith.constant 1 : i32
    %0 = arith.muli %arg1, %c1_i32 : i32
    %1 = arith.addi %0, %arg2 : i32
    %c0_i32 = arith.constant 0 : i32
    %c0_i32_0 = arith.constant 0 : i32
    return %arg0, %c0_i32, %1 : i32, i32, i32
  }
  func.func @transform_2(%arg0: i32, %arg1: i32, %arg2: i32) -> (i32, i32, i32, i32) {
    %c0_i32 = arith.constant 0 : i32
    %c0_i32_0 = arith.constant 0 : i32
    %c0_i32_1 = arith.constant 0 : i32
    return %arg0, %arg1, %c0_i32, %c0_i32_0 : i32, i32, i32, i32
  }
  func.func @transform_3(%arg0: i32, %arg1: i32, %arg2: i32) -> (i32, i32, i32, i32) {
    %c0_i32 = arith.constant 0 : i32
    %c0_i32_0 = arith.constant 0 : i32
    %c0_i32_1 = arith.constant 0 : i32
    return %arg0, %arg1, %c0_i32, %c0_i32_0 : i32, i32, i32, i32
  }
  func.func @transform_4(%arg0: i32, %arg1: i32, %arg2: i32) -> (i32, i32, i32, i32) {
    %c0_i32 = arith.constant 0 : i32
    %c0_i32_0 = arith.constant 0 : i32
    %c0_i32_1 = arith.constant 0 : i32
    return %arg0, %arg1, %c0_i32, %c0_i32_0 : i32, i32, i32, i32
  }
}

</mosaic_0001>

<bundles_post_ra>
// kernel: tpu_custom_call.1
= control target key start
LH: loop header
LB: loop body
LE: loop exit
PB: predicated region body
PF: predicated region fallthrough
CT: control target
= control target key end

     0   :  { %10 = vsyncpa [#allocation6], 0  ;;  %s1064_s0 = inlined_call_operand.hbm [shape: f32[2,4,256], index: 0, kind: input, shape index: {}]   ;;  %s1065_s1 = inlined_call_operand.hbm [shape: s32[2,1,256], index: 1, kind: input, shape index: {}]   ;;  %s1066_s2 = inlined_call_operand.vmem [shape: f32[2,1,4,1], index: 2, kind: output, shape index: {0}]   ;;  %s1067_s3 = inlined_call_operand.vmem [shape: f32[2,1,4,1], index: 3, kind: output, shape index: {1}]   ;;  %s1068_s4 = inlined_call_operand.vmem [shape: f32[2,1,4,1], index: 4, kind: output, shape index: {2}]  }
   0x1   :  { %12 = vsyncpa [#allocation6 + $0x1], 0 }
   0x2   :  { %13 = vsyncpa [#allocation8], 0 }
   0x3   :  { %15 = vsyncpa [#allocation8 + $0x1], 0  ;;  %s910_s15 = smov 0   ;;  %s912_s16 = smov 0  }
   0x4   :  { %s914_s17 = smov 0   ;;  %s916_s18 = smov 0  }
   0x5   :  { %s918_s19 = smov 0   ;;  %s920_s20 = smov 0  }
   0x6 LB: > { %s683_s21 = sadd.s32 4294967295, %s882_s20   ;;  %s40_s22 = sadd.s32 1, %s878_s19  ;;  %s882_s20 = sphi %s920_s20, %s21_s20   ;;  %s878_s19 = sphi %s918_s19, %s1080_s19   ;;  %s874_s18 = sphi %s916_s18, %s1079_s18   ;;  %s870_s17 = sphi %s914_s17, %s1078_s17   ;;  %s866_s16 = sphi %s912_s16, %s1077_s16   ;;  %s862_s15 = sphi %s910_s15, %s1076_s15  }
   0x7   : > { %p42_p0 = scmp.ge.s32.totalorder %s40_s22, 2  ;;  %s51_s23 = sadd.s32 1, %s870_s17 }
   0x8   : > { %p58_p1 = scmp.ne.s32.totalorder %s870_s17, %s866_s16  ;;  %p59_p2 = scmp.eq.s32.totalorder %s882_s20, 0 }
   0x9   : > { %s1082_s22 = smov (%p42_p0, %s40_s22), 0  ;;  %p64_p4 = scmp.ne.s32.totalorder %s866_s16, %s862_s15 }
   0xa   : > { %p946_p3 = por %p59_p2, %p58_p1  ;;  %s46_s25 = ssub.s32 %s878_s19, %s1082_s22 }
   0xb   : > { %p65_p5 = scmp.eq.s32.totalorder %s683_s21, 0  ;;  %p49_p6 = scmp.eq.s32.totalorder %s46_s25, 0 }
   0xc   : > { %p712_p8 = scmp.lt.s32.totalorder %s882_s20, 2  ;;  %s202_s28 = sand.u32 1, %s870_s17  }
   0xd   : > { %p953_p7 = por %p65_p5, %p64_p4  ;;  %s700_s29 = sshll.u32 %s878_s19, 3 }
   0xe   : > { %s959_s27 = scalar_select %p49_p6, %s870_s17, %s51_s23  }
   0xf   : > { %s687_s30 = sshll.u32 %s202_s28, 3  ;;  %s214_s7 = scalar_lea.hbm %s1064_s0, %s700_s29 }
  0x10   : > { %s216_s8 = sshll.u32 %s214_s7, 4  ;;  %s206_s9 = scalar_lea.vmem [#allocation5], %s687_s30  ;;  %s217_s8 = int_to_ptr.hbm [resolvable:$true] %s216_s8 }
  0x11   : > { %s218_s10 = sshll.u32 %s206_s9, 4  ;;  %p968_p9 = pnand %p712_p8, %p946_p3  ;;  %s219_s10 = int_to_ptr.vmem [resolvable:$true] %s218_s10 }
  0x12   : > { %p692_p10 = scmp.ge.s32.totalorder %s882_s20, 1  ;;  %p245_p11 = scmp.lt.s32.totalorder %s882_s20, 3 }
  0x13   : > { %s690_s12 = sshll.u32 %s202_s28, 1  ;;  %s203_s13 = scalar_lea.sflag [#allocation6], %s202_s28 }
  0x14   : > { %708 = dma.hbm_to_vmem [thread:$0]  (!%p968_p9), %s217_s8, 128, %s219_s10, %s203_s13  }
  0x15   : > { %p246_p12 = pnand %p692_p10, %p245_p11  ;;  %s691_s14 = sshll.u32 %s878_s19, 1 }
  0x16   : > { %s229_s15 = scalar_lea.vmem [#allocation7], %s690_s12  ;;  %s236_s24 = scalar_lea.hbm %s1065_s1, %s691_s14 }
  0x17   : > { %s240_s21 = sshll.u32 %s229_s15, 4  ;;  %s238_s29 = sshll.u32 %s236_s24, 4  ;;  %s241_s21 = int_to_ptr.vmem [resolvable:$true] %s240_s21  ;;  %s239_s29 = int_to_ptr.hbm [resolvable:$true] %s238_s29 }
  0x18   : > { %s226_s30 = scalar_lea.sflag [#allocation8], %s202_s28  ;;  %249 = sbr.rel (%p246_p12) target bundleno = 261 (0x105), region = 28 }
  0x19   : > { %711 = dma.hbm_to_vmem [thread:$0]  (!%p968_p9), %s239_s29, 32, %s241_s21, %s226_s30  }
  0x1a   : > { %s251_s5 = sand.u32 (!%p246_p12), 1, %s866_s16  }
  0x1b   : > { %s693_s6 = sshll.u32 (!%p246_p12), %s251_s5, 3  ;;  %s252_s7 = scalar_lea.sflag (!%p246_p12), [#allocation6], %s251_s5 }
  0x1c   : > { %s255_s8 = scalar_lea.vmem (!%p246_p12), [#allocation5], %s693_s6 }
  0x1d   : > { %853 = dma.done.wait (%p953_p7), %s252_s7, 128  }
  0x1e   : > { %855 = vsyncadd (%p953_p7), %s252_s7, 4294967168  ;;  %s694_s9 = sshll.u32 %s251_s5, 1  ;;  %s262_s10 = scalar_lea.sflag [#allocation8], %s251_s5 }
  0x1f   : > { %s987_s12 = scalar_lea.vmem [#allocation7], %s694_s9 }
  0x20   : > { %857 = dma.done.wait (%p953_p7), %s262_s10, 32  }
  0x21   : > { %859 = vsyncadd (%p953_p7), %s262_s10, 4294967264  ;;  %v345_v0 = vld [vmem:[%s255_s8] sm:$0xff]  ;;  %vm353_vm0 = vcmask 1043456   ;;  %v430_v34 = vlaneseq  ;;  %v346_v35 = vld [vmem:[%s987_s12] sm:$0x3]  ;;  %v884_v45 = vmov 0.0  }
  0x22   : > { %348 = vst [vmem:[#allocation1] ss:$2 sm:$0xff] %v345_v0  ;;  %v432_v41 = vperm.slane %v346_v35, 0  ;;  %v433_v42 = vperm.slane %v346_v35, 1  ;;  %vm341_vm7 = vcmask 3072   ;;  %p316_p13 = scmp.lt.s32.totalorder %s874_s18, 1 }
  0x23   : > { %v431_v40 = vshrl.u32 %v430_v34, 7  ;;  %342 = vst.msk [vmem:[#allocation2] sm:$0xf] %vm341_vm7, %v884_v45 }
  0x24   : > { %343 = vst.msk [vmem:[#allocation3] sm:$0xf] %vm341_vm7, %v884_v45  ;;  %s1084_s18 = smov (!%p316_p13, %s874_s18), 1 }
  0x25   : > { %vm1002_vm1 = vcmp.eq.s32.totalorder %v431_v40, %v432_v41  ;;  %vm1006_vm2 = vcmp.eq.s32.totalorder %v431_v40, %v433_v42  ;;  %344 = vst.msk [vmem:[#allocation4] sm:$0xf] %vm341_vm7, %v884_v45  ;;  %s695_s26 = sshll.u32 %s1084_s18, 2 }
  0x26   : > { %v467_v46 = vsel %vm1002_vm1, 1.0, %v884_v45  ;;  %v468_v47 = vsel %vm1006_vm2, 1.0, %v884_v45  ;;  %s336_s13 = scalar_lea.vmem %s1068_s4, %s695_s26  ;;  %s322_s21 = scalar_lea.vmem %s1066_s2, %s695_s26 }
  0x27   : > { %v469_v48 = vsel %vm353_vm0, %v467_v46, 0.0  ;;  %v470_v49 = vsel %vm353_vm0, %v468_v47, 0.0  ;;  %s329_s25 = scalar_lea.vmem %s1067_s3, %s695_s26 }
  0x28   : > { %v471_v51 = vadd.f32 %v470_v49, %v469_v48 }
  0x29   : > { %v349_v1 = vld.sshfl [vmem:[#allocation1] sm:$0xff pattern:$0x75316420]  ;;  %v350_v2 = vld.sshfl [vmem:[#allocation1 + $0x8] sm:$0xff pattern:$0x75316420] }
  0x2a   : > { %v354_v3 = vsel %vm353_vm0, %v349_v1, -inf  ;;  %v361_v4 = vsel %vm353_vm0, %v350_v2, -inf  ;;  %472 = vadd.xlane.f32.xlu1 %v471_v51 }
  0x2b   : > { %v355_v5 = vrot.slane %v354_v3, 4  ;;  %v362_v6 = vrot.slane %v361_v4, 4 }
  0x2d   : > { %v356_v7 = vmax.f32 %v354_v3, %v355_v5  ;;  %v363_v8 = vmax.f32 %v361_v4, %v362_v6 }
  0x2f   : > { %v357_v9 = vrot.slane %v356_v7, 2  ;;  %v364_v10 = vrot.slane %v363_v8, 2 }
  0x31   : > { %v358_v11 = vmax.f32 %v356_v7, %v357_v9  ;;  %v365_v12 = vmax.f32 %v363_v8, %v364_v10 }
  0x33   : > { %v359_v13 = vrot.slane %v358_v11, 1  ;;  %v366_v14 = vrot.slane %v365_v12, 1 }
  0x35   : > { %v360_v15 = vmax.f32 %v358_v11, %v359_v13  ;;  %v367_v16 = vmax.f32 %v365_v12, %v366_v14 }
  0x37   : > { %v370_v17 = vrot.slane %v367_v16, 4 }
  0x39   : > { %v371_v18 = vsel %vm353_vm0, %v360_v15, %v370_v17 }
  0x3a   : > { %v373_v19 = vsub.f32 %v345_v0, %v371_v18 }
  0x3c   : > { %v374_v20 = vmul.f32 1.442695, %v373_v19 }
  0x3e   : > { %762 = vpow2.f32 %v374_v20 }
  0x44   : > { %v996_v21 = vpop.eup %762 }
  0x45   : > { %377 = vst [vmem:[#allocation1] ss:$2 sm:$0xff] %v996_v21 }
  0x4c   : > { %v378_v22 = vld.sshfl [vmem:[#allocation1] sm:$0xff pattern:$0x75316420]  ;;  %v379_v23 = vld.sshfl [vmem:[#allocation1 + $0x8] sm:$0xff pattern:$0x75316420] }
  0x4d   : > { %v382_v24 = vsel %vm353_vm0, %v378_v22, 0.0  ;;  %v389_v25 = vsel %vm353_vm0, %v379_v23, 0.0  ;;  %v466_v23 = vld [vmem:[#allocation4] sm:$0xf] }
  0x4e   : > { %v383_v26 = vrot.slane %v382_v24, 4  ;;  %v390_v27 = vrot.slane %v389_v25, 4 }
  0x50   : > { %v384_v28 = vadd.f32 %v383_v26, %v382_v24  ;;  %v391_v29 = vadd.f32 %v390_v27, %v389_v25  ;;  %v436_v26 = vld [vmem:[#allocation2] sm:$0xf] }
  0x52   : > { %v385_v30 = vrot.slane %v384_v28, 2  ;;  %v392_v31 = vrot.slane %v391_v29, 2 }
  0x54   : > { %v386_v32 = vadd.f32 %v385_v30, %v384_v28  ;;  %v393_v33 = vadd.f32 %v392_v31, %v391_v29  ;;  %v453_v29 = vld [vmem:[#allocation3] sm:$0xf] }
  0x56   : > { %v387_v36 = vrot.slane %v386_v32, 1  ;;  %v394_v37 = vrot.slane %v393_v33, 1 }
  0x58   : > { %v388_v38 = vadd.f32 %v387_v36, %v386_v32  ;;  %v395_v39 = vadd.f32 %v394_v37, %v393_v33 }
  0x5a   : > { %764 = vrcp.f32 %v388_v38  ;;  %vm401_vm3 = vweird.f32 %v388_v38  ;;  %v405_v54 = vand.u32 2147483647, %v388_v38  ;;  %v407_v57 = vand.u32 2147483648, %v388_v38 }
  0x5b   : > { %766 = vrcp.f32 %v395_v39  ;;  %v421_v58 = vand.u32 2147483648, %v395_v39  ;;  %vm415_vm5 = vweird.f32 %v395_v39  ;;  %v419_v60 = vand.u32 2147483647, %v395_v39 }
  0x5c   : > { %v408_v0 = vor.u32 1.1754944e-38, %v407_v57  ;;  %vm406_vm10 = vcmp.eq.f32.partialorder %v405_v54, 8.507059e+37 }
  0x5d   : > { %v422_v1 = vor.u32 1.1754944e-38, %v421_v58  ;;  %vm420_vm11 = vcmp.eq.f32.partialorder %v419_v60, 8.507059e+37 }
  0x60   : > { %v765_v50 = vpop.eup %764 }
  0x61   : > { %v767_v52 = vpop.eup %766  ;;  %v397_v53 = vmul.f32 %v765_v50, %v388_v38  ;;  %vm402_vm4 = vweird.f32 %v765_v50 }
  0x62   : > { %v411_v55 = vmul.f32 %v767_v52, %v395_v39  ;;  %vm416_vm6 = vweird.f32 %v767_v52  ;;  %vm403_vm8 = vmor %vm401_vm3, %vm402_vm4 }
  0x63   : > { %v398_v56 = vsub.f32 1.0, %v397_v53  ;;  %vm417_vm9 = vmor %vm415_vm5, %vm416_vm6 }
  0x64   : > { %v412_v59 = vsub.f32 1.0, %v411_v55 }
  0x65   : > { %v399_v61 = vmul.f32 %v765_v50, %v398_v56 }
  0x66   : > { %v413_v62 = vmul.f32 %v767_v52, %v412_v59 }
  0x67   : > { %v400_v63 = vadd.f32 %v765_v50, %v399_v61 }
  0x68   : > { %v414_v2 = vadd.f32 %v767_v52, %v413_v62 }
  0x69   : > { %v404_v3 = vsel %vm403_vm8, %v765_v50, %v400_v63 }
  0x6a   : > { %v418_v4 = vsel %vm417_vm9, %v767_v52, %v414_v2  ;;  %v409_v5 = vsel %vm406_vm10, %v408_v0, %v404_v3 }
  0x6b   : > { %v423_v6 = vsel %vm420_vm11, %v422_v1, %v418_v4 }
  0x6c   : > { %v426_v7 = vrot.slane %v423_v6, 4 }
  0x6e   : > { %v427_v8 = vsel %vm353_vm0, %v409_v5, %v426_v7 }
  0x6f   : > { %v429_v9 = vmul.f32 %v996_v21, %v427_v8 }
  0x71   : > { %438 = vst [vmem:[#allocation1] ss:$2 sm:$0xff] %v429_v9 }
  0x78   : > { %v439_v10 = vld.sshfl [vmem:[#allocation1] sm:$0xff pattern:$0x75316420]  ;;  %v440_v11 = vld.sshfl [vmem:[#allocation1 + $0x8] sm:$0xff pattern:$0x75316420] }
  0x79   : > { %v443_v12 = vsel %vm1002_vm1, %v439_v10, 0.0  ;;  %v444_v13 = vsel %vm1006_vm2, %v440_v11, 0.0  ;;  %454 = vst [vmem:[#allocation1] ss:$2 sm:$0xff] %v429_v9 }
  0x7a   : > { %v445_v14 = vsel %vm353_vm0, %v443_v12, 0.0  ;;  %v446_v15 = vsel %vm353_vm0, %v444_v13, 0.0 }
  0x7b   : > { %v447_v16 = vadd.f32 %v446_v15, %v445_v14 }
  0x7d   : > { %448 = vadd.xlane.f32.xlu0 %v447_v16 }
  0x80   : > { %v455_v17 = vld.sshfl [vmem:[#allocation1] sm:$0xff pattern:$0x75316420]  ;;  %v456_v18 = vld.sshfl [vmem:[#allocation1 + $0x8] sm:$0xff pattern:$0x75316420] }
  0x81   : > { %v459_v19 = vsel %vm353_vm0, %v455_v17, 0.0  ;;  %v460_v20 = vsel %vm353_vm0, %v456_v18, 0.0 }
  0x82   : > { %v461_v21 = vadd.f32 %v460_v20, %v459_v19 }
  0x85   : > { %462 = vadd.xlane.f32.xlu0 %v461_v21 }
  0x9d   : > { %v473_v22 = vpop.xlane.xlu1 %472 }
  0x9e   : > { %v474_v24 = vadd.f32 %v473_v22, %v466_v23 }
  0xa0   : > { %475 = vst.msk [vmem:[#allocation4] sm:$0xf] %vm341_vm7, %v474_v24 }
  0xa7   : > { %v483_v25 = vld [vmem:[#allocation4] sm:$0xf] }
  0xa8   : > { %484 = vst.msk [vmem:[%s336_s13] sm:$0xf] %vm341_vm7, %v483_v25 }
  0xf0   : > { %v449_v27 = vpop.xlane.xlu0 %448 }
  0xf1   : > { %v450_v28 = vadd.f32 %v449_v27, %v436_v26 }
  0xf3   : > { %452 = vst.msk [vmem:[#allocation2] sm:$0xf] %vm341_vm7, %v450_v28 }
  0xf8   : > { %v463_v30 = vpop.xlane.xlu0 %462 }
  0xf9   : > { %v464_v31 = vadd.f32 %v463_v30, %v453_v29 }
  0xfa   : > { %v479_v32 = vld [vmem:[#allocation2] sm:$0xf] }
  0xfb   : > { %480 = vst.msk [vmem:[%s322_s21] sm:$0xf] %vm341_vm7, %v479_v32 }
  0xfc   : > { %465 = vst.msk [vmem:[#allocation3] sm:$0xf] %vm341_vm7, %v464_v31 }
 0x103   : > { %v481_v33 = vld [vmem:[#allocation3] sm:$0xf] }
 0x104   : > { %482 = vst.msk [vmem:[%s329_s25] sm:$0xf] %vm341_vm7, %v481_v33 }
 0x105 PF: > { %s21_s20 = sadd.s32 1, %s882_s20   ;;  %s1076_s15 = smov %s866_s16 }
 0x106   : > { %p18_p0 = scmp.ge.s32.totalorder %s21_s20, 4   ;;  %s1077_s16 = smov %s870_s17 }
 0x107   : > { %s1078_s17 = smov %s959_s27  ;;  %s1079_s18 = smov %s878_s19 }
 0x108   : > { %s1080_s19 = smov %s1082_s22  ;;  %20 = sbr.rel (!%p18_p0) target bundleno = 6 (0x6), region = 113 }
 0x10d   :  { %550 = vsyncpa [#allocation6], 1 }
 0x10e   :  { %552 = vsyncpa [#allocation6 + $0x1], 1 }
 0x10f   :  { %553 = vsyncpa [#allocation8], 1 }
 0x110   :  { %555 = vsyncpa [#allocation8 + $0x1], 1 }

</bundles_post_ra>
